<compile_context>
chip_gen: v6e
topology: v6e:2x2x1
jax: 0.10.0
libtpu: 0.0.40
codegen_flags: <defaults>
</compile_context>

<pallas_src>
import numpy as np
import jax
import jax.numpy as jnp
from jax import lax
from jax.experimental import pallas as pl
from jax.experimental.pallas import tpu as pltpu

_MASK_VAL = -(2.0 ** 32) + 1.0
_LANES = 128


def _din_attention_kernel(
    q_ref,      # (BB, E)        query embeddings   (matmul dtype)
    k_ref,      # (BB, T, E)     keys embeddings    (matmul dtype)
    len_ref,    # (BB, 1) int32  valid history length per row
    w1_ref,     # (3E, H1)       merged folded W1 = [Wq+Wd ; Wk-Wd ; Wp]
    p1_ref,     # (5, H1) f32    rows: bias1, bn_scale1, bn_shift1, alpha1, 1-alpha1
    w2_ref,     # (H1, H2)
    p2_ref,     # (5, H2) f32    rows: bias2, bn_scale2, bn_shift2, alpha2*w3, (1-alpha2)*w3
    o_ref,      # (BB, E) f32    attention-pooled history
):
    BB, T, E = k_ref.shape
    H2 = w2_ref.shape[1]
    mm_dtype = w1_ref.dtype

    q = q_ref[...]                                           # (BB, E)
    k3 = k_ref[...]                                          # (BB, T, E)

    # ---- layer 1: one merged matmul ------------------------------------------
    # concat([q, k, q-k, q*k]) @ W1 == concat([q, k, q*k]) @ [Wq+Wd; Wk-Wd; Wp]
    qb = jnp.broadcast_to(q[:, None, :], (BB, T, E))
    lhs = jnp.concatenate([qb, k3, qb * k3], axis=-1).reshape(BB * T, 3 * E)

    p1 = p1_ref[...]                                         # (5, H1) f32
    h = jnp.dot(lhs, w1_ref[...], preferred_element_type=jnp.float32) + p1[0:1, :]
    # Dice (eval-mode BN folded): x * (alpha + (1-alpha)*sigmoid(bn(x)))
    xp = jax.nn.sigmoid(h * p1[1:2, :] + p1[2:3, :])
    h = h * (p1[3:4, :] + p1[4:5, :] * xp)                   # (BB*T, H1) f32

    # ---- layer 2 --------------------------------------------------------------
    p2 = p2_ref[...]                                         # (5, H2) f32
    h2 = jnp.dot(h.astype(mm_dtype), w2_ref[...],
                 preferred_element_type=jnp.float32) + p2[0:1, :]   # (BB*T, H2) f32
    xp2 = jax.nn.sigmoid(h2 * p2[1:2, :] + p2[2:3, :])
    # w3 folded into the Dice gate; b3 dropped (softmax shift invariance).
    gate = p2[3:4, :] + p2[4:5, :] * xp2
    score = jnp.sum((h2 * gate).reshape(BB, T, H2), axis=-1)        # (BB, T)

    # ---- mask (supports_masking=False) + weight_normalization=True softmax ----
    t_idx = lax.broadcasted_iota(jnp.int32, (BB, T), 1)
    valid = t_idx < len_ref[...]                                     # (BB, T)
    score = jnp.where(valid, score, jnp.float32(_MASK_VAL))
    m = jnp.max(score, axis=-1, keepdims=True)
    e = jnp.exp(score - m)
    w = e / jnp.sum(e, axis=-1, keepdims=True)                       # (BB, T)

    # ---- weighted sum over keys (f32) ------------------------------------------
    o = jnp.sum(w[:, :, None] * k3.astype(jnp.float32), axis=1)      # (BB, E)
    o_ref[...] = o.astype(o_ref.dtype)


def _round_up(x, m):
    return ((x + m - 1) // m) * m


def _vmem_bytes_estimate(bb, T, E, mm_itemsize):
    """Honest per-step VMEM estimate: lane padding to 128, double buffering,
    and the f32 intermediates (lhs, h, xp, h2, xp2, gate, score, ...)."""
    e_pad = _round_up(E, _LANES)
    keys = 2 * bb * T * e_pad * mm_itemsize                 # double-buffered keys tile
    small = 2 * bb * e_pad * (mm_itemsize + 4 + 4)          # query / lengths / output tiles
    tmps = 8 * bb * T * _LANES * 4                          # f32 intermediates (~8 live tiles)
    return keys + small + tmps


def _choose_block_b(B, T, E, mm_itemsize, target_rows=4096,
                    vmem_budget=40 * 1024 * 1024):
    """Pick a batch block so BLOCK_B*T is a long MXU-shaped slab (amortizes the
    ~0.35us per-grid-step overhead) while the double-buffered keys tile plus f32
    intermediates stay within a budget that fits v7x's 64 MiB VMEM."""
    bb = _round_up(max(8, pl.cdiv(target_rows, T)), 8)
    bb = min(bb, _round_up(B, 8))                 # don't pad far beyond the real batch
    if B >= 16:
        # guarantee >= 2 grid steps so dimension_semantics=("parallel",) can
        # feed both v7x TensorCores
        bb = min(bb, _round_up(pl.cdiv(B, 2), 8))
    while bb > 8 and _vmem_bytes_estimate(bb, T, E, mm_itemsize) > vmem_budget:
        bb -= 8
    return bb


def din_attention_pallas(query_emb, keys_emb, keys_length, params, *,
                         matmul_dtype=jnp.bfloat16, block_b=None):
    """query_emb (B,1,E), keys_emb (B,T,E), keys_length (B,) -> hist (B,1,E)."""
    B, T, E = keys_emb.shape
    H1 = params["w1"].shape[1]
    H2 = params["w2"].shape[1]
    f32 = jnp.float32

    # Fold W1 algebraically and merge into one (3E, H1) RHS (wrapper-side JAX).
    w1 = params["w1"].astype(f32)
    wq = w1[0 * E:1 * E] + w1[2 * E:3 * E]                   # W_query + W_diff
    wk = w1[1 * E:2 * E] - w1[2 * E:3 * E]                   # W_keys  - W_diff
    wp = w1[3 * E:4 * E]                                     # W_prod
    w1f = jnp.concatenate([wq, wk, wp], axis=0).astype(matmul_dtype)   # (3E, H1)
    w2 = params["w2"].astype(matmul_dtype)                              # (H1, H2)

    # Packed per-channel vectors.
    # p1 rows: [bias, bn_scale, bn_shift, alpha, 1-alpha]
    p1 = jnp.concatenate([params["b1"], params["s1"], params["t1"],
                          params["a1"], 1.0 - params["a1"]], axis=0).astype(f32)   # (5, H1)
    # p2 rows: [bias, bn_scale, bn_shift, alpha*w3, (1-alpha)*w3]  (w3 folded in;
    # b3 dropped — constant logit shift is a softmax no-op).
    w3r = params["w3"].T.astype(f32)                                    # (1, H2)
    p2 = jnp.concatenate([params["b2"], params["s2"], params["t2"],
                          params["a2"] * w3r, (1.0 - params["a2"]) * w3r],
                         axis=0).astype(f32)                            # (5, H2)

    mm_itemsize = jnp.dtype(matmul_dtype).itemsize
    if block_b is None:
        block_b = _choose_block_b(B, T, E, mm_itemsize)
    Bp = _round_up(B, block_b)

    vmem_limit = _vmem_bytes_estimate(block_b, T, E, mm_itemsize) + (8 << 20)
    vmem_limit = int(min(48 << 20, max(16 << 20, vmem_limit)))   # safe on v5e/v6e/v7x

    q2 = query_emb.reshape(B, E).astype(matmul_dtype)
    k3 = keys_emb.astype(matmul_dtype)
    lens = keys_length.astype(jnp.int32).reshape(B, 1)
    if Bp != B:
        # Padded rows: zero keys + length 0 -> masked-uniform softmax over zero
        # keys -> zero output; sliced off below.
        q2 = jnp.pad(q2, ((0, Bp - B), (0, 0)))
        k3 = jnp.pad(k3, ((0, Bp - B), (0, 0), (0, 0)))
        lens = jnp.pad(lens, ((0, Bp - B), (0, 0)))

    def const(shape):
        return pl.BlockSpec(shape, lambda g, _shape=shape: (0,) * len(_shape))

    grid_spec = pltpu.PrefetchScalarGridSpec(
        num_scalar_prefetch=0,
        grid=(Bp // block_b,),
        in_specs=[
            pl.BlockSpec((block_b, E), lambda g: (g, 0)),          # query
            pl.BlockSpec((block_b, T, E), lambda g: (g, 0, 0)),    # keys (streamed)
            pl.BlockSpec((block_b, 1), lambda g: (g, 0)),          # lengths
            const((3 * E, H1)),                                    # merged folded W1
            const((5, H1)),                                        # packed layer-1 vectors
            const((H1, H2)),                                       # layer-2 weight
            const((5, H2)),                                        # packed layer-2 vectors (w3 folded)
        ],
        out_specs=pl.BlockSpec((block_b, E), lambda g: (g, 0)),
    )

    hist = pl.pallas_call(
        _din_attention_kernel,
        out_shape=jax.ShapeDtypeStruct((Bp, E), f32),
        grid_spec=grid_spec,
        compiler_params=pltpu.CompilerParams(
            dimension_semantics=("parallel",),      # shards batch blocks across v7x's 2 TCs
            vmem_limit_bytes=vmem_limit),
    )(q2, k3, lens, w1f, p1, w2, p2)
    return hist[:B].reshape(B, 1, E)


def din_attention_ref(query_emb, keys_emb, keys_length, params):
    """Pure-JAX reference (mirrors AttentionSequencePoolingLayer forward)."""
    B, T, E = keys_emb.shape
    qt = jnp.broadcast_to(query_emb, (B, T, E))
    att_in = jnp.concatenate([qt, keys_emb, qt - keys_emb, qt * keys_emb], axis=-1)
    h = att_in @ params["w1"] + params["b1"]
    xp = jax.nn.sigmoid(h * params["s1"] + params["t1"])
    h = params["a1"] * (1.0 - xp) * h + xp * h
    h2 = h @ params["w2"] + params["b2"]
    xp2 = jax.nn.sigmoid(h2 * params["s2"] + params["t2"])
    h2 = params["a2"] * (1.0 - xp2) * h2 + xp2 * h2
    score = (h2 @ params["w3"] + params["b3"])[..., 0]          # (B, T)
    mask = jnp.arange(T)[None, :] < keys_length[:, None]
    score = jnp.where(mask, score, _MASK_VAL)
    w = jax.nn.softmax(score, axis=-1)
    return jnp.einsum("bt,bte->be", w, keys_emb)[:, None, :]    # (B, 1, E)


def init_params(key, att_emb_dim, att_hidden_size=(64, 16), init_std=1e-4, eps=1e-8):
    """Deterministic synthetic init mirroring the torch module's shapes.
    DNN linear weights ~ N(0, init_std); biases ~ U(+-1/sqrt(fan_in));
    final dense uses default Linear-style init.  Dice: BN(gamma=1, beta=0,
    running_mean=0, running_var=1) folded to (scale, shift); alpha = 0.
    """
    # TODO(synk): Dice's BatchNorm1d is evaluated in inference mode (running
    # stats); training-mode batch statistics are not reproduced.
    H1, H2 = att_hidden_size
    D4 = 4 * att_emb_dim
    ks = jax.random.split(key, 6)
    f32 = jnp.float32

    w1 = init_std * jax.random.normal(ks[0], (D4, H1), f32)
    b1 = jax.random.uniform(ks[1], (1, H1), f32, -1.0 / np.sqrt(D4), 1.0 / np.sqrt(D4))
    w2 = init_std * jax.random.normal(ks[2], (H1, H2), f32)
    b2 = jax.random.uniform(ks[3], (1, H2), f32, -1.0 / np.sqrt(H1), 1.0 / np.sqrt(H1))
    w3 = jax.random.uniform(ks[4], (H2, 1), f32, -1.0 / np.sqrt(H2), 1.0 / np.sqrt(H2))
    b3 = jax.random.uniform(ks[5], (1, 1), f32, -1.0 / np.sqrt(H2), 1.0 / np.sqrt(H2))

    def dice_params(h):
        gamma = jnp.ones((1, h), f32)
        beta = jnp.zeros((1, h), f32)
        mean = jnp.zeros((1, h), f32)
        var = jnp.ones((1, h), f32)
        scale = gamma / jnp.sqrt(var + eps)
        shift = beta - mean * scale
        alpha = jnp.zeros((1, h), f32)
        return scale, shift, alpha

    s1, t1, a1 = dice_params(H1)
    s2, t2, a2 = dice_params(H2)
    return dict(w1=w1, b1=b1, s1=s1, t1=t1, a1=a1,
                w2=w2, b2=b2, s2=s2, t2=t2, a2=a2,
                w3=w3, b3=b3)


def my_din_forward(X_cols, keys_length, tables, params, **kw):
    """Glue mirroring my_DIN.forward: per-feature embedding lookup, split into
    query (position 0) / keys (positions 1:), concat along emb dim, then the
    Pallas attention kernel.  Returns (hist, query_emb_list)."""
    seq_embed_list = [tables[i][X_cols[i]] for i in range(len(tables))]   # (B, 1+T, d_i)
    query_emb_list = [e[:, 0:1, :] for e in seq_embed_list]
    keys_emb_list = [e[:, 1:, :] for e in seq_embed_list]
    query_emb = jnp.concatenate(query_emb_list, axis=-1)                  # (B, 1, E)
    keys_emb = jnp.concatenate(keys_emb_list, axis=-1)                    # (B, T, E)
    hist = din_attention_pallas(query_emb, keys_emb, keys_length, params, **kw)
    return hist, query_emb_list


def _make_inputs(key, B, T, emb_dims, vocabs):
    k_emb, k_x, k_len = jax.random.split(key, 3)
    tab_keys = jax.random.split(k_emb, len(emb_dims))
    tables = [0.1 * jax.random.normal(tab_keys[i], (vocabs[i], emb_dims[i]), jnp.float32)
              for i in range(len(emb_dims))]
    x_keys = jax.random.split(k_x, len(emb_dims))
    X_cols = [jax.random.randint(x_keys[i], (B, 1 + T), 0, vocabs[i])
              for i in range(len(emb_dims))]
    keys_length = jax.random.randint(k_len, (B,), 1, T + 1).astype(jnp.int32)
    return tables, X_cols, keys_length


if __name__ == "__main__":
    key = jax.random.PRNGKey(0)
    emb_dims = (16, 16)        # two history features -> interest dim E = 32
    vocabs = (20, 30)
    E = sum(emb_dims)
    T = 8

    k_in1, k_in2, k_par = jax.random.split(key, 3)
    params = init_params(k_par, E, att_hidden_size=(64, 16), init_std=1e-4)

    # --- scenario 1: small batch (B=2) -----------------------------------------
    tables, X_cols, keys_length = _make_inputs(k_in1, 2, T, emb_dims, vocabs)

    # f32 matmul path: tight check against the f32 reference.
    hist_f32, query_emb_list = my_din_forward(X_cols, keys_length, tables, params,
                                              matmul_dtype=jnp.float32)
    hist_f32 = jax.block_until_ready(hist_f32)

    query_emb = jnp.concatenate(query_emb_list, axis=-1)
    keys_emb = jnp.concatenate(
        [tables[i][X_cols[i]][:, 1:, :] for i in range(len(tables))], axis=-1)
    ref = din_attention_ref(query_emb, keys_emb, keys_length, params)
    np.testing.assert_allclose(np.asarray(hist_f32), np.asarray(ref), rtol=1e-4, atol=1e-5)

    # Default bf16 matmul path (MXU-friendly); f32 accumulation & softmax, so a
    # loose tolerance vs the f32 reference is expected.
    hist_bf16, _ = my_din_forward(X_cols, keys_length, tables, params)
    hist_bf16 = jax.block_until_ready(hist_bf16)
    np.testing.assert_allclose(np.asarray(hist_bf16), np.asarray(ref),
                               rtol=2e-2, atol=2e-2)

    # --- scenario 2: B not a multiple of the block -> padding + multi-step grid --
    tables2, X_cols2, keys_length2 = _make_inputs(k_in2, 19, T, emb_dims, vocabs)
    # explicit small block to force a multi-step grid at this tiny batch
    hist2, qlist2 = my_din_forward(X_cols2, keys_length2, tables2, params,
                                   matmul_dtype=jnp.float32, block_b=8)
    hist2 = jax.block_until_ready(hist2)
    query_emb2 = jnp.concatenate(qlist2, axis=-1)
    keys_emb2 = jnp.concatenate(
        [tables2[i][X_cols2[i]][:, 1:, :] for i in range(len(tables2))], axis=-1)
    ref2 = din_attention_ref(query_emb2, keys_emb2, keys_length2, params)
    np.testing.assert_allclose(np.asarray(hist2), np.asarray(ref2), rtol=1e-4, atol=1e-5)

    # auto-chosen block (bf16 default) on the same ragged batch, loose tolerance
    hist2b, _ = my_din_forward(X_cols2, keys_length2, tables2, params)
    hist2b = jax.block_until_ready(hist2b)
    np.testing.assert_allclose(np.asarray(hist2b), np.asarray(ref2),
                               rtol=2e-2, atol=2e-2)

    print("KERNEL_OK")
</pallas_src>

<mosaic_0001>
module attributes {stable_mosaic.version = 11 : i64} {
  func.func @_din_attention_kernel(%arg0: i32, %arg1: memref<8x32xf32, #tpu.memory_space<vmem>>, %arg2: memref<8x8x32xf32, #tpu.memory_space<vmem>>, %arg3: memref<8x1xi32, #tpu.memory_space<vmem>>, %arg4: memref<96x64xf32, #tpu.memory_space<vmem>>, %arg5: memref<5x64xf32, #tpu.memory_space<vmem>>, %arg6: memref<64x16xf32, #tpu.memory_space<vmem>>, %arg7: memref<5x16xf32, #tpu.memory_space<vmem>>, %arg8: memref<8x32xf32, #tpu.memory_space<vmem>>) attributes {dimension_semantics = [#tpu.dimension_semantics<parallel>], iteration_bounds = array<i64: 1>, scalar_prefetch = 0 : i64, scratch_operands = 0 : i64, tpu.core_type = #tpu.core_type<tc>, window_params = [{transform_indices = @transform_0, window_bounds = array<i64: 8, 32>}, {transform_indices = @transform_1, window_bounds = array<i64: 8, 8, 32>}, {transform_indices = @transform_2, window_bounds = array<i64: 8, 1>}, {pipeline_mode = #tpu.pipeline_mode<synchronous>, transform_indices = @transform_3, window_bounds = array<i64: 96, 64>}, {pipeline_mode = #tpu.pipeline_mode<synchronous>, transform_indices = @transform_4, window_bounds = array<i64: 5, 64>}, {pipeline_mode = #tpu.pipeline_mode<synchronous>, transform_indices = @transform_5, window_bounds = array<i64: 64, 16>}, {pipeline_mode = #tpu.pipeline_mode<synchronous>, transform_indices = @transform_6, window_bounds = array<i64: 5, 16>}, {transform_indices = @transform_7, window_bounds = array<i64: 8, 32>}]} {
    %c0 = arith.constant 0 : index
    %c0_0 = arith.constant 0 : index
    %0 = vector.load %arg1[%c0, %c0_0] : memref<8x32xf32, #tpu.memory_space<vmem>>, vector<8x32xf32>
    %c0_1 = arith.constant 0 : index
    %c0_2 = arith.constant 0 : index
    %c0_3 = arith.constant 0 : index
    %1 = vector.load %arg2[%c0_1, %c0_2, %c0_3] : memref<8x8x32xf32, #tpu.memory_space<vmem>>, vector<8x8x32xf32>
    %2 = vector.shape_cast %0 : vector<8x32xf32> to vector<8x1x32xf32>
    %3 = vector.shape_cast %2 : vector<8x1x32xf32> to vector<8x1x32xf32>
    %4 = vector.broadcast %3 : vector<8x1x32xf32> to vector<8x8x32xf32>
    %5 = arith.mulf %4, %1 : vector<8x8x32xf32>
    %6 = tpu.concatenate %4, %1, %5 in 2 : vector<8x8x32xf32>, vector<8x8x32xf32>, vector<8x8x32xf32> -> vector<8x8x96xf32>
    %7 = vector.shape_cast %6 : vector<8x8x96xf32> to vector<64x96xf32>
    %c0_4 = arith.constant 0 : index
    %c0_5 = arith.constant 0 : index
    %8 = vector.load %arg5[%c0_4, %c0_5] : memref<5x64xf32, #tpu.memory_space<vmem>>, vector<5x64xf32>
    %c0_6 = arith.constant 0 : index
    %c0_7 = arith.constant 0 : index
    %9 = vector.load %arg4[%c0_6, %c0_7] : memref<96x64xf32, #tpu.memory_space<vmem>>, vector<96x64xf32>
    %cst = arith.constant dense<0.000000e+00> : vector<64x64xf32>
    %10 = tpu.matmul %7, %9, %cst {dimension_numbers = #tpu.dot_dimension_numbers<[1], [0], [0], [1], [0, 0, 1, 1], [], []>} : vector<64x96xf32>, vector<96x64xf32>, vector<64x64xf32> -> vector<64x64xf32>
    %11 = vector.extract_strided_slice %8 {offsets = [0, 0], sizes = [1, 64], strides = [1, 1]} : vector<5x64xf32> to vector<1x64xf32>
    %12 = vector.broadcast %11 : vector<1x64xf32> to vector<64x64xf32>
    %13 = arith.addf %10, %12 : vector<64x64xf32>
    %14 = vector.extract_strided_slice %8 {offsets = [1, 0], sizes = [1, 64], strides = [1, 1]} : vector<5x64xf32> to vector<1x64xf32>
    %15 = vector.broadcast %14 : vector<1x64xf32> to vector<64x64xf32>
    %16 = arith.mulf %13, %15 : vector<64x64xf32>
    %17 = vector.extract_strided_slice %8 {offsets = [2, 0], sizes = [1, 64], strides = [1, 1]} : vector<5x64xf32> to vector<1x64xf32>
    %18 = vector.broadcast %17 : vector<1x64xf32> to vector<64x64xf32>
    %19 = arith.addf %16, %18 : vector<64x64xf32>
    %20 = arith.negf %19 : vector<64x64xf32>
    %21 = math.exp %20 : vector<64x64xf32>
    %cst_8 = arith.constant 1.000000e+00 : f32
    %22 = vector.broadcast %cst_8 : f32 to vector<64x64xf32>
    %23 = arith.addf %22, %21 : vector<64x64xf32>
    %24 = arith.divf %22, %23 : vector<64x64xf32>
    %25 = vector.extract_strided_slice %8 {offsets = [3, 0], sizes = [1, 64], strides = [1, 1]} : vector<5x64xf32> to vector<1x64xf32>
    %26 = vector.extract_strided_slice %8 {offsets = [4, 0], sizes = [1, 64], strides = [1, 1]} : vector<5x64xf32> to vector<1x64xf32>
    %27 = vector.broadcast %26 : vector<1x64xf32> to vector<64x64xf32>
    %28 = arith.mulf %27, %24 : vector<64x64xf32>
    %29 = vector.broadcast %25 : vector<1x64xf32> to vector<64x64xf32>
    %30 = arith.addf %29, %28 : vector<64x64xf32>
    %31 = arith.mulf %13, %30 : vector<64x64xf32>
    %c0_9 = arith.constant 0 : index
    %c0_10 = arith.constant 0 : index
    %32 = vector.load %arg7[%c0_9, %c0_10] : memref<5x16xf32, #tpu.memory_space<vmem>>, vector<5x16xf32>
    %c0_11 = arith.constant 0 : index
    %c0_12 = arith.constant 0 : index
    %33 = vector.load %arg6[%c0_11, %c0_12] : memref<64x16xf32, #tpu.memory_space<vmem>>, vector<64x16xf32>
    %cst_13 = arith.constant dense<0.000000e+00> : vector<64x16xf32>
    %34 = tpu.matmul %31, %33, %cst_13 {dimension_numbers = #tpu.dot_dimension_numbers<[1], [0], [0], [1], [0, 0, 1, 1], [], []>} : vector<64x64xf32>, vector<64x16xf32>, vector<64x16xf32> -> vector<64x16xf32>
    %35 = vector.extract_strided_slice %32 {offsets = [0, 0], sizes = [1, 16], strides = [1, 1]} : vector<5x16xf32> to vector<1x16xf32>
    %36 = vector.broadcast %35 : vector<1x16xf32> to vector<64x16xf32>
    %37 = arith.addf %34, %36 : vector<64x16xf32>
    %38 = vector.extract_strided_slice %32 {offsets = [1, 0], sizes = [1, 16], strides = [1, 1]} : vector<5x16xf32> to vector<1x16xf32>
    %39 = vector.broadcast %38 : vector<1x16xf32> to vector<64x16xf32>
    %40 = arith.mulf %37, %39 : vector<64x16xf32>
    %41 = vector.extract_strided_slice %32 {offsets = [2, 0], sizes = [1, 16], strides = [1, 1]} : vector<5x16xf32> to vector<1x16xf32>
    %42 = vector.broadcast %41 : vector<1x16xf32> to vector<64x16xf32>
    %43 = arith.addf %40, %42 : vector<64x16xf32>
    %44 = arith.negf %43 : vector<64x16xf32>
    %45 = math.exp %44 : vector<64x16xf32>
    %cst_14 = arith.constant 1.000000e+00 : f32
    %46 = vector.broadcast %cst_14 : f32 to vector<64x16xf32>
    %47 = arith.addf %46, %45 : vector<64x16xf32>
    %48 = arith.divf %46, %47 : vector<64x16xf32>
    %49 = vector.extract_strided_slice %32 {offsets = [3, 0], sizes = [1, 16], strides = [1, 1]} : vector<5x16xf32> to vector<1x16xf32>
    %50 = vector.extract_strided_slice %32 {offsets = [4, 0], sizes = [1, 16], strides = [1, 1]} : vector<5x16xf32> to vector<1x16xf32>
    %51 = vector.broadcast %50 : vector<1x16xf32> to vector<64x16xf32>
    %52 = arith.mulf %51, %48 : vector<64x16xf32>
    %53 = vector.broadcast %49 : vector<1x16xf32> to vector<64x16xf32>
    %54 = arith.addf %53, %52 : vector<64x16xf32>
    %55 = arith.mulf %37, %54 : vector<64x16xf32>
    %56 = vector.shape_cast %55 : vector<64x16xf32> to vector<8x8x16xf32>
    %cst_15 = arith.constant dense<0.000000e+00> : vector<8x8xf32>
    %57 = vector.multi_reduction <add>, %56, %cst_15 [2] : vector<8x8x16xf32> to vector<8x8xf32>
    %58 = tpu.iota {dimensions = array<i32: 1>} : vector<8x8xi32>
    %c0_16 = arith.constant 0 : index
    %c0_17 = arith.constant 0 : index
    %59 = vector.load %arg3[%c0_16, %c0_17] : memref<8x1xi32, #tpu.memory_space<vmem>>, vector<8x1xi32>
    %60 = vector.broadcast %59 : vector<8x1xi32> to vector<8x8xi32>
    %61 = arith.cmpi slt, %58, %60 : vector<8x8xi32>
    %cst_18 = arith.constant -4.2949673E+9 : f32
    %62 = vector.broadcast %cst_18 : f32 to vector<8x8xf32>
    %63 = arith.select %61, %57, %62 : vector<8x8xi1>, vector<8x8xf32>
    %cst_19 = arith.constant dense<0xFF800000> : vector<8xf32>
    %64 = vector.multi_reduction <maximumf>, %63, %cst_19 [1] : vector<8x8xf32> to vector<8xf32>
    %65 = vector.shape_cast %64 : vector<8xf32> to vector<8x1xf32>
    %66 = vector.broadcast %65 : vector<8x1xf32> to vector<8x8xf32>
    %67 = arith.subf %63, %66 : vector<8x8xf32>
    %68 = math.exp %67 : vector<8x8xf32>
    %cst_20 = arith.constant dense<0.000000e+00> : vector<8xf32>
    %69 = vector.multi_reduction <add>, %68, %cst_20 [1] : vector<8x8xf32> to vector<8xf32>
    %70 = vector.shape_cast %69 : vector<8xf32> to vector<8x1xf32>
    %71 = vector.broadcast %70 : vector<8x1xf32> to vector<8x8xf32>
    %72 = arith.divf %68, %71 : vector<8x8xf32>
    %73 = vector.shape_cast %72 : vector<8x8xf32> to vector<8x8x1xf32>
    %74 = vector.broadcast %73 : vector<8x8x1xf32> to vector<8x8x32xf32>
    %75 = arith.mulf %74, %1 : vector<8x8x32xf32>
    %cst_21 = arith.constant dense<0.000000e+00> : vector<8x32xf32>
    %76 = vector.multi_reduction <add>, %75, %cst_21 [1] : vector<8x8x32xf32> to vector<8x32xf32>
    %c0_22 = arith.constant 0 : index
    %c0_23 = arith.constant 0 : index
    %77 = vector.load %arg8[%c0_22, %c0_23] : memref<8x32xf32, #tpu.memory_space<vmem>>, vector<8x32xf32>
    tpu.vector_store %arg8[%c0_22, %c0_23], %76 {strides = array<i32>} : memref<8x32xf32, #tpu.memory_space<vmem>>, vector<8x32xf32>,
    return
  }
  func.func @transform_0(%arg0: i32) -> (i32, i32) {
    %c0_i32 = arith.constant 0 : i32
    %c0_i32_0 = arith.constant 0 : i32
    return %arg0, %c0_i32 : i32, i32
  }
  func.func @transform_1(%arg0: i32) -> (i32, i32, i32) {
    %c0_i32 = arith.constant 0 : i32
    %c0_i32_0 = arith.constant 0 : i32
    %c0_i32_1 = arith.constant 0 : i32
    return %arg0, %c0_i32, %c0_i32_0 : i32, i32, i32
  }
  func.func @transform_2(%arg0: i32) -> (i32, i32) {
    %c0_i32 = arith.constant 0 : i32
    %c0_i32_0 = arith.constant 0 : i32
    return %arg0, %c0_i32 : i32, i32
  }
  func.func @transform_3(%arg0: i32) -> (i32, i32) {
    %c0_i32 = arith.constant 0 : i32
    %c0_i32_0 = arith.constant 0 : i32
    %c0_i32_1 = arith.constant 0 : i32
    return %c0_i32, %c0_i32_0 : i32, i32
  }
  func.func @transform_4(%arg0: i32) -> (i32, i32) {
    %c0_i32 = arith.constant 0 : i32
    %c0_i32_0 = arith.constant 0 : i32
    %c0_i32_1 = arith.constant 0 : i32
    return %c0_i32, %c0_i32_0 : i32, i32
  }
  func.func @transform_5(%arg0: i32) -> (i32, i32) {
    %c0_i32 = arith.constant 0 : i32
    %c0_i32_0 = arith.constant 0 : i32
    %c0_i32_1 = arith.constant 0 : i32
    return %c0_i32, %c0_i32_0 : i32, i32
  }
  func.func @transform_6(%arg0: i32) -> (i32, i32) {
    %c0_i32 = arith.constant 0 : i32
    %c0_i32_0 = arith.constant 0 : i32
    %c0_i32_1 = arith.constant 0 : i32
    return %c0_i32, %c0_i32_0 : i32, i32
  }
  func.func @transform_7(%arg0: i32) -> (i32, i32) {
    %c0_i32 = arith.constant 0 : i32
    %c0_i32_0 = arith.constant 0 : i32
    return %arg0, %c0_i32 : i32, i32
  }
}

</mosaic_0001>

<bundles_post_ra>
// kernel: tpu_custom_call.1
= control target key start
LH: loop header
LB: loop body
LE: loop exit
PB: predicated region body
PF: predicated region fallthrough
CT: control target
= control target key end

     0   :  { %v41_v2 = vlaneseq  ;;  %s1194_s28 = smov 32   ;;  %v1195_v3 = vmov 1966171168   ;;  %s1606_s0 = inlined_call_operand.vmem [shape: f32[8,32], index: 0, kind: input, shape index: {}]   ;;  %s1607_s1 = inlined_call_operand.vmem [shape: f32[8,8,32], index: 1, kind: input, shape index: {}]   ;;  %s1608_s2 = inlined_call_operand.vmem [shape: s32[8,1], index: 2, kind: input, shape index: {}]   ;;  %s1609_s3 = inlined_call_operand.vmem [shape: f32[96,64], index: 3, kind: input, shape index: {}]   ;;  %s1610_s4 = inlined_call_operand.vmem [shape: f32[5,64], index: 4, kind: input, shape index: {}]   ;;  %s1611_s5 = inlined_call_operand.vmem [shape: f32[64,16], index: 5, kind: input, shape index: {}]   ;;  %s1612_s6 = inlined_call_operand.vmem [shape: f32[5,16], index: 6, kind: input, shape index: {}]   ;;  %s1613_s7 = inlined_call_operand.hbm [shape: f32[8,32], index: 7, kind: output, shape index: {}]  }
   0x1   :  { %v1242_v0 = vld [vmem:[%s1607_s1] sm:$0xff]  ;;  %v1247_v1 = vld [vmem:[%s1607_s1 + $0x18] sm:$0xff]  ;;  %v39_v4 = vunpack.c.l.s4 %v1195_v3  ;;  %v1256_v5 = vld [vmem:[%s1607_s1 + $0x8] sm:$0xff] }
   0x2   :  { %142 = vrot.lane.b32.xlu0 %v1242_v0, %s1194_s28  ;;  %148 = vrot.lane.b32.xlu1 %v1247_v1, %s1194_s28  ;;  %v1261_v6 = vld [vmem:[%s1607_s1 + $0x28] sm:$0xff]  ;;  %v27_v7 = vld [vmem:[%s1606_s0] sm:$0xff]  ;;  %v1267_v8 = vshrl.u32 %v41_v2, 7 }
   0x3   :  { %v40_v9 = vunpack.c.0.s8 %v39_v4  ;;  %v37_v10 = vcombine.high %v27_v7, %v27_v7  ;;  %v228_v11 = vld [vmem:[%s1609_s3 + $0x58] sm:$0xff]  ;;  %v227_v12 = vld [vmem:[%s1609_s3 + $0x50] sm:$0xff]  ;;  %v226_v18 = vld [vmem:[%s1609_s3 + $0x48] sm:$0xff] }
   0x4   :  { %1032 = vmatprep.subr.mxu0 %v228_v11  ;;  %v1283_v14 = vld [vmem:[%s1607_s1 + $0x10] sm:$0xff]  ;;  %v1286_v16 = vsub.s32 0, %v1267_v8 }
   0x5   :  { %v43_v13 = vsub.s32 %v40_v9, %v1267_v8  ;;  %1033 = vmatpush3.msra.mxu0 %v228_v11 }
   0x6   :  { %144 = vrot.lane.b32.xlu0 %v1256_v5, %s1194_s28  ;;  %152 = vrot.lane.b32.xlu1 %v1261_v6, %s1194_s28 }
   0x7   :  { %v44_v15 = vrot.slane %v27_v7, %v43_v13  ;;  %v51_v17 = vrot.slane %v37_v10, %v43_v13  ;;  %1034 = vmatprep.subr.mxu0 %v227_v12 }
   0x8   :  { %12 = vsyncpa [#allocation3], 0  ;;  %1035 = vmatpush3.msra.mxu0 %v227_v12  ;;  %v225_v22 = vld [vmem:[%s1609_s3 + $0x40] sm:$0xff]  ;;  %v224_v28 = vld [vmem:[%s1609_s3 + $0x38] sm:$0xff]  ;;  %s1196_s27 = smov 64   ;;  %vm198_vm0 = vcmask 261120  }
   0x9   :  { %v60_v19 = vrot.slane %v44_v15, %v43_v13  ;;  %v52_v20 = vcombine.high %v44_v15, %v44_v15  ;;  %v67_v21 = vrot.slane %v51_v17, %v43_v13  ;;  %v1299_v23 = vld [vmem:[%s1607_s1 + $0x20] sm:$0xff]  ;;  %1036 = vmatprep.subr.mxu0 %v226_v18  ;;  %v53_v27 = vcombine.high %v51_v17, %v51_v17  ;;  %v223_v34 = vld [vmem:[%s1609_s3 + $0x30] sm:$0xff]  ;;  %v222_v39 = vld [vmem:[%s1609_s3 + $0x28] sm:$0xff] }
   0xa   :  { %146 = vrot.lane.b32.xlu0 %v1283_v14, %s1194_s28  ;;  %1037 = vmatpush3.msra.mxu0 %v226_v18  ;;  %v221_v42 = vld [vmem:[%s1609_s3 + $0x20] sm:$0xff]  ;;  %v220_v45 = vld [vmem:[%s1609_s3 + $0x18] sm:$0xff]  ;;  %v1354_v47 = vld [vmem:[%s1607_s1 + $0x30] sm:$0xff]  ;;  %vm207_vm1 = vcmask 523264   ;;  %vm233_vm2 = vcmask 785408   ;;  %vm713_vm3 = vcmask 130048  }
   0xb   :  { %v1302_v24 = vrot.slane %v60_v19, %v1286_v16  ;;  %v82_v25 = vcombine.high %v60_v19, %v60_v19  ;;  %v74_v26 = vrot.slane %v52_v20, %v43_v13  ;;  %1038 = vmatprep.subr.mxu0 %v225_v22  ;;  %v1318_v32 = vrot.slane %v67_v21, %v1286_v16  ;;  %v219_v48 = vld [vmem:[%s1609_s3 + $0x10] sm:$0xff]  ;;  %v218_v51 = vld [vmem:[%s1609_s3 + $0x8] sm:$0xff]  ;;  %v217_v53 = vld [vmem:[%s1609_s3] sm:$0xff] }
   0xc   :  { %1039 = vmatpush3.msra.mxu0 %v225_v22  ;;  %v81_v37 = vrot.slane %v53_v27, %v43_v13  ;;  %v83_v41 = vcombine.high %v67_v21, %v67_v21  ;;  %v1376_v55 = vld [vmem:[%s1607_s1 + $0x38] sm:$0xff]  ;;  %vm785_vm4 = vcmask 1041409   ;;  %vm787_vm5 = vcmask 1042434  }
   0xd   :  { %v126_v29 = vmul.f32 %v1302_v24, %v1242_v0  ;;  %v1312_v30 = vrot.slane %v82_v25, %v1286_v16  ;;  %v1315_v31 = vrot.slane %v74_v26, %v1286_v16  ;;  %v84_v33 = vcombine.high %v74_v26, %v74_v26  ;;  %1040 = vmatprep.subr.mxu0 %v224_v28 }
   0xe   :  { %150 = vrot.lane.b32.xlu0 %v1299_v23, %s1194_s28  ;;  %1041 = vmatpush3.msra.mxu0 %v224_v28  ;;  %v130_v40 = vmul.f32 %v1318_v32, %v1299_v23  ;;  %v1344_v44 = vrot.slane %v81_v37, %v1286_v16  ;;  %v113_v46 = vrot.slane %v83_v41, %v1286_v16  ;;  %v468_v41 = vld [vmem:[%s1611_s5] sm:$0xff]  ;;  %vm789_vm6 = vcmask 1043459  }
   0xf   :  { %174 = vrot.lane.b32.xlu1 %v126_v29, %s1196_s27  ;;  %v128_v35 = vmul.f32 %v1312_v30, %v1283_v14  ;;  %v127_v36 = vmul.f32 %v1315_v31, %v1256_v5  ;;  %v1329_v38 = vrot.slane %v84_v33, %v1286_v16  ;;  %1042 = vmatprep.subr.mxu0 %v223_v34  ;;  %vm791_vm7 = vcmask 1044484  }
  0x10   :  { %1043 = vmatpush3.msra.mxu0 %v223_v34  ;;  %v131_v49 = vmul.f32 %v1344_v44, %v1261_v6  ;;  %v85_v50 = vcombine.high %v81_v37, %v81_v37  ;;  %v132_v52 = vmul.f32 %v113_v46, %v1354_v47  ;;  %v475_v34 = vld [vmem:[%s1611_s5 + $0x38] sm:$0xff]  ;;  %v472_v37 = vld [vmem:[%s1611_s5 + $0x20] sm:$0xff]  ;;  %vm793_vm8 = vcmask 1045509  }
  0x11   :  { %v129_v43 = vmul.f32 %v1329_v38, %v1247_v1  ;;  %1044 = vmatprep.subr.mxu0 %v222_v39  ;;  %1068 = vmatprep.subr.mxu1 %v475_v34  ;;  %vm795_vm9 = vcmask 1046534   ;;  %vm797_vm10 = vcmask 1047559   ;;  %vm801_vm11 = vcmask 64512  }
  0x12   :  { %178 = vrot.lane.b32.xlu0 %v128_v35, %s1196_s27  ;;  %1045 = vmatpush3.msra.mxu0 %v222_v39  ;;  %v117_v54 = vrot.slane %v85_v50, %v1286_v16  ;;  %v474_v35 = vld [vmem:[%s1611_s5 + $0x30] sm:$0xff] }
  0x13   :  { %176 = vrot.lane.b32.xlu1 %v127_v36, %s1196_s27  ;;  %1046 = vmatprep.subr.mxu0 %v221_v42  ;;  %v473_v36 = vld [vmem:[%s1611_s5 + $0x28] sm:$0xff]  ;;  %v470_v39 = vld [vmem:[%s1611_s5 + $0x10] sm:$0xff] }
  0x14   :  { %1047 = vmatpush3.msra.mxu0 %v221_v42  ;;  %v133_v56 = vmul.f32 %v117_v54, %v1376_v55  ;;  %1069 = vmatpush3.msra.mxu1 %v475_v34  ;;  %v1440_v42 = vld [vmem:[%s1610_s4] sm:$0x1f] }
  0x15   :  { %1048 = vmatprep.subr.mxu0 %v220_v45  ;;  %1070 = vmatprep.subr.mxu1 %v474_v35 }
  0x16   :  { %182 = vrot.lane.b32.xlu0 %v130_v40, %s1196_s27  ;;  %1049 = vmatpush3.msra.mxu0 %v220_v45  ;;  %v469_v40 = vld [vmem:[%s1611_s5 + $0x8] sm:$0xff]  ;;  %v1448_v45 = vsub.s32 2, %v1267_v8 }
  0x17   :  { %180 = vrot.lane.b32.xlu1 %v129_v43, %s1196_s27  ;;  %1050 = vmatprep.subr.mxu0 %v219_v48  ;;  %v1443_v43 = vsub.s32 1, %v1267_v8 }
  0x18   :  { %1051 = vmatpush3.msra.mxu0 %v219_v48  ;;  %1071 = vmatpush3.msra.mxu1 %v474_v35  ;;  %v378_v50 = vrot.slane %v1440_v42, %v1448_v45 }
  0x19   :  { %1052 = vmatprep.subr.mxu0 %v218_v51  ;;  %1072 = vmatprep.subr.mxu1 %v473_v36 }
  0x1a   :  { %154 = vrot.lane.b32.xlu0 %v1354_v47, %s1194_s28  ;;  %1053 = vmatpush3.msra.mxu0 %v218_v51 }
  0x1b   :  { %184 = vrot.lane.b32.xlu1 %v131_v49, %s1196_s27  ;;  %1054 = vmatprep.subr.mxu0 %v217_v53 }
  0x1c   :  { %1055 = vmatpush3.msra.mxu0 %v217_v53  ;;  %1073 = vmatpush3.msra.mxu1 %v473_v36 }
  0x1d   :  { %1074 = vmatprep.subr.mxu1 %v472_v37 }
  0x1e   :  { %186 = vrot.lane.b32.xlu0 %v132_v52, %s1196_s27  ;;  %1075 = vmatpush3.msra.mxu1 %v472_v37 }
  0x1f   :  { %156 = vrot.lane.b32.xlu1 %v1376_v55, %s1194_s28 }
  0x23   :  { %188 = vrot.lane.b32.xlu1 %v133_v56, %s1196_s27 }
  0x74   :  { %v143_v57 = vpop.permute.xlu0 %142  ;;  %v149_v58 = vpop.permute.xlu1 %148 }
  0x75   :  { %v199_v63 = vsel %vm198_vm0, %v1302_v24, %v143_v57  ;;  %v202_v17 = vsel %vm198_vm0, %v1329_v38, %v149_v58  ;;  %v471_v38 = vld [vmem:[%s1611_s5 + $0x18] sm:$0xff] }
  0x76   :  { %1076 = vmatprep.subr.mxu1 %v471_v38 }
  0x77   :  { %1077 = vmatpush3.msra.mxu1 %v471_v38 }
  0x78   :  { %v145_v59 = vpop.permute.xlu0 %144  ;;  %v153_v61 = vpop.permute.xlu1 %152  ;;  %1078 = vmatprep.subr.mxu1 %v470_v39 }
  0x79   :  { %v200_v9 = vsel %vm198_vm0, %v1315_v31, %v145_v59  ;;  %v204_v24 = vsel %vm198_vm0, %v1344_v44, %v153_v61  ;;  %1079 = vmatpush3.msra.mxu1 %v470_v39  ;;  %v232_v44 = vrot.slane %v1440_v42, %v1286_v16 }
  0x7a   :  { %1080 = vmatprep.subr.mxu1 %v469_v40 }
  0x7b   :  { %1081 = vmatpush3.msra.mxu1 %v469_v40 }
  0x7c   :  { %v147_v60 = vpop.permute.xlu0 %146  ;;  %1082 = vmatprep.subr.mxu1 %v468_v41 }
  0x7d   :  { %v201_v11 = vsel %vm198_vm0, %v1312_v30, %v147_v60  ;;  %1083 = vmatpush3.msra.mxu1 %v468_v41 }
  0x80   :  { %v151_v62 = vpop.permute.xlu0 %150 }
  0x81   :  { %v175_v3 = vpop.permute.xlu1 %174  ;;  %v203_v19 = vsel %vm198_vm0, %v1318_v32, %v151_v62 }
  0x82   :  { %v208_v4 = vsel %vm207_vm1, %v199_v63, %v175_v3 }
  0x83   :  { %1056 = vmatprep.mubr.msk.f32.mxu0 %vm233_vm2, %v208_v4 }
  0x84   :  { %v179_v7 = vpop.permute.xlu0 %178 }
  0x85   :  { %v177_v10 = vpop.permute.xlu1 %176  ;;  %v210_v13 = vsel %vm207_vm1, %v201_v11, %v179_v7 }
  0x86   :  { %v209_v12 = vsel %vm207_vm1, %v200_v9, %v177_v10 }
  0x87   :  { %1057 = vmatmul.mubr.msk.f32.vlgmr.msra.gmra.mxu0 %vm233_vm2, %v209_v12 }
  0x88   :  { %v183_v15 = vpop.permute.xlu0 %182  ;;  %1059 = vmatprep.mubr.msk.f32.mxu0 %vm233_vm2, %v210_v13 }
  0x89   :  { %v181_v18 = vpop.permute.xlu1 %180  ;;  %v212_v21 = vsel %vm207_vm1, %v203_v19, %v183_v15 }
  0x8a   :  { %v211_v20 = vsel %vm207_vm1, %v202_v17, %v181_v18 }
  0x8b   :  { %1060 = vmatmul.mubr.msk.f32.gmra.mxu0 %vm233_vm2, %v211_v20 }
  0x8c   :  { %v155_v22 = vpop.permute.xlu0 %154  ;;  %1062 = vmatprep.mubr.msk.f32.mxu0 %vm233_vm2, %v212_v21 }
  0x8d   :  { %v205_v25 = vsel %vm198_vm0, %v113_v46, %v155_v22  ;;  %v185_v26 = vpop.permute.xlu1 %184  ;;  %v366_v46 = vrot.slane %v1440_v42, %v1443_v43 }
  0x8e   :  { %v213_v27 = vsel %vm207_vm1, %v204_v24, %v185_v26 }
  0x8f   :  { %1063 = vmatmul.mubr.msk.f32.gmra.mxu0 %vm233_vm2, %v213_v27 }
  0x90   :  { %v187_v28 = vpop.permute.xlu0 %186 }
  0x91   :  { %v214_v29 = vsel %vm207_vm1, %v205_v25, %v187_v28  ;;  %v157_v30 = vpop.permute.xlu1 %156 }
  0x92   :  { %1065 = vmatprep.mubr.msk.f32.mxu0 %vm233_vm2, %v214_v29  ;;  %v206_v31 = vsel %vm198_vm0, %v117_v54, %v157_v30 }
  0x95   :  { %v189_v32 = vpop.permute.xlu1 %188 }
  0x96   :  { %v215_v33 = vsel %vm207_vm1, %v206_v31, %v189_v32 }
  0x97   :  { %1066 = vmatmul.mubr.msk.f32.gmra.mxu0 %vm233_vm2, %v215_v33 }
 0x147   :  { %v1058_v48 = vpop.f32.mrf.mxu0 }
 0x148   :  { %v1452_v49 = vadd.f32 %v1058_v48, %v232_v44 }
 0x149   :  { %v324_v51 = vpop.f32.mrf.mxu0 }
 0x14a   :  { %v368_v52 = vmul.f32 %v366_v46, %v1452_v49  ;;  %v1457_v53 = vadd.f32 %v324_v51, %v232_v44  ;;  %v1479_v51 = vsub.s32 4, %v1267_v8 }
 0x14b   :  { %v1061_v54 = vpop.f32.mrf.mxu0 }
 0x14c   :  { %v380_v56 = vadd.f32 %v378_v50, %v368_v52  ;;  %v367_v57 = vmul.f32 %v366_v46, %v1457_v53  ;;  %v1460_v58 = vadd.f32 %v1061_v54, %v232_v44  ;;  %v1482_v54 = vsub.s32 3, %v1267_v8 }
 0x14d   :  { %v334_v59 = vpop.f32.mrf.mxu0 }
 0x14e   :  { %v973_v60 = vmul.f32 -1.442695, %v380_v56  ;;  %v379_v61 = vadd.f32 %v378_v50, %v367_v57  ;;  %v370_v62 = vmul.f32 %v366_v46, %v1460_v58  ;;  %v1463_v63 = vadd.f32 %v334_v59, %v232_v44 }
 0x14f   :  { %v1064_v3 = vpop.f32.mrf.mxu0  ;;  %v438_v56 = vrot.slane %v1440_v42, %v1479_v51  ;;  %v450_v59 = vrot.slane %v1440_v42, %v1482_v54 }
 0x150   :  { %1104 = vpow2.f32 %v973_v60  ;;  %v972_v4 = vmul.f32 -1.442695, %v379_v61  ;;  %v382_v7 = vadd.f32 %v378_v50, %v370_v62  ;;  %v369_v9 = vmul.f32 %v366_v46, %v1463_v63 }
 0x151   :  { %v1466_v10 = vadd.f32 %v1064_v3, %v232_v44  ;;  %v344_v11 = vpop.f32.mrf.mxu0 }
 0x152   :  { %1106 = vpow2.f32 %v972_v4  ;;  %v975_v12 = vmul.f32 -1.442695, %v382_v7  ;;  %v381_v13 = vadd.f32 %v378_v50, %v369_v9  ;;  %v1468_v15 = vadd.f32 %v344_v11, %v232_v44 }
 0x153   :  { %v372_v17 = vmul.f32 %v366_v46, %v1466_v10 }
 0x154   :  { %1108 = vpow2.f32 %v975_v12  ;;  %v974_v18 = vmul.f32 -1.442695, %v381_v13  ;;  %v371_v19 = vmul.f32 %v366_v46, %v1468_v15 }
 0x155   :  { %v384_v20 = vadd.f32 %v378_v50, %v372_v17 }
 0x156   :  { %1110 = vpow2.f32 %v974_v18  ;;  %v383_v21 = vadd.f32 %v378_v50, %v371_v19 }
 0x157   :  { %v977_v22 = vmul.f32 -1.442695, %v384_v20  ;;  %v1067_v24 = vpop.f32.mrf.mxu0 }
 0x158   :  { %v976_v25 = vmul.f32 -1.442695, %v383_v21  ;;  %v1472_v26 = vadd.f32 %v1067_v24, %v232_v44 }
 0x159   :  { %1112 = vpow2.f32 %v977_v22  ;;  %v354_v27 = vpop.f32.mrf.mxu0 }
 0x15a   :  { %1114 = vpow2.f32 %v976_v25  ;;  %v374_v28 = vmul.f32 %v366_v46, %v1472_v26  ;;  %v1475_v29 = vadd.f32 %v354_v27, %v232_v44 }
 0x15c   :  { %v386_v30 = vadd.f32 %v378_v50, %v374_v28  ;;  %v373_v31 = vmul.f32 %v366_v46, %v1475_v29 }
 0x15d   :  { %v1105_v32 = vpop.eup %1104 }
 0x15e   :  { %v412_v33 = vadd.f32 1.0, %v1105_v32  ;;  %v979_v34 = vmul.f32 -1.442695, %v386_v30  ;;  %v385_v35 = vadd.f32 %v378_v50, %v373_v31 }
 0x15f   :  { %v1107_v36 = vpop.eup %1106 }
 0x160   :  { %1116 = vrcp.f32 %v412_v33  ;;  %v411_v37 = vadd.f32 1.0, %v1107_v36  ;;  %v978_v38 = vmul.f32 -1.442695, %v385_v35 }
 0x161   :  { %v1109_v39 = vpop.eup %1108  ;;  %1118 = vpow2.f32 %v979_v34 }
 0x162   :  { %1120 = vrcp.f32 %v411_v37  ;;  %v414_v40 = vadd.f32 1.0, %v1109_v39 }
 0x163   :  { %v1111_v41 = vpop.eup %1110  ;;  %1122 = vpow2.f32 %v978_v38 }
 0x164   :  { %1124 = vrcp.f32 %v414_v40  ;;  %v413_v44 = vadd.f32 1.0, %v1111_v41 }
 0x166   :  { %v1113_v48 = vpop.eup %1112  ;;  %1126 = vrcp.f32 %v413_v44 }
 0x167   :  { %v1115_v46 = vpop.eup %1114  ;;  %v416_v52 = vadd.f32 1.0, %v1113_v48 }
 0x168   :  { %v415_v50 = vadd.f32 1.0, %v1115_v46 }
 0x169   :  { %1128 = vrcp.f32 %v416_v52 }
 0x16a   :  { %1130 = vrcp.f32 %v415_v50 }
 0x16d   :  { %v1117_v57 = vpop.eup %1116 }
 0x16e   :  { %v1119_v60 = vpop.eup %1118  ;;  %v440_v61 = vmul.f32 %v1117_v57, %v438_v56 }
 0x16f   :  { %v1121_v62 = vpop.eup %1120  ;;  %v418_v3 = vadd.f32 1.0, %v1119_v60 }
 0x170   :  { %v1123_v4 = vpop.eup %1122  ;;  %v439_v7 = vmul.f32 %v1121_v62, %v438_v56  ;;  %v452_v11 = vadd.f32 %v450_v59, %v440_v61 }
 0x171   :  { %v1125_v9 = vpop.eup %1124  ;;  %1132 = vrcp.f32 %v418_v3  ;;  %v417_v12 = vadd.f32 1.0, %v1123_v4 }
 0x172   :  { %v442_v13 = vmul.f32 %v1125_v9, %v438_v56  ;;  %v451_v17 = vadd.f32 %v450_v59, %v439_v7  ;;  %v460_v21 = vmul.f32 %v452_v11, %v1452_v49 }
 0x173   :  { %v1127_v18 = vpop.eup %1126  ;;  %1134 = vrcp.f32 %v417_v12 }
 0x174   :  { %v441_v19 = vmul.f32 %v1127_v18, %v438_v56  ;;  %v459_v20 = vmul.f32 %v451_v17, %v1457_v53  ;;  %v454_v42 = vadd.f32 %v450_v59, %v442_v13 }
 0x176   :  { %v1129_v22 = vpop.eup %1128  ;;  %v453_v24 = vadd.f32 %v450_v59, %v441_v19  ;;  %1084 = vmatprep.mubr.msk.f32.mxu1 %vm207_vm1, %v459_v20  ;;  %v462_v31 = vmul.f32 %v454_v42, %v1460_v58 }
 0x177   :  { %v1131_v25 = vpop.eup %1130  ;;  %v444_v27 = vmul.f32 %v1129_v22, %v438_v56  ;;  %1085 = vmatmul.mubr.msk.f32.vlgmr.msra.gmra.mxu1 %vm207_vm1, %v460_v21 }
 0x178   :  { %v461_v28 = vmul.f32 %v453_v24, %v1463_v63  ;;  %v443_v30 = vmul.f32 %v1131_v25, %v438_v56 }
 0x179   :  { %v456_v32 = vadd.f32 %v450_v59, %v444_v27 }
 0x17a   :  { %v455_v33 = vadd.f32 %v450_v59, %v443_v30  ;;  %1087 = vmatprep.mubr.msk.f32.mxu1 %vm207_vm1, %v461_v28 }
 0x17b   :  { %1088 = vmatmul.mubr.msk.f32.gmra.mxu1 %vm207_vm1, %v462_v31  ;;  %v464_v53 = vmul.f32 %v456_v32, %v1466_v10  ;;  %v1507_v10 = vld [vmem:[%s1612_s6] sm:$0x1f] }
 0x17c   :  { %v463_v49 = vmul.f32 %v455_v33, %v1468_v15  ;;  %v1197_v15 = vmov 0   ;;  %v479_v40 = vrot.slane %v1507_v10, %v1286_v16  ;;  %v624_v44 = vrot.slane %v1507_v10, %v1448_v45 }
 0x17d   :  { %1101 = vset.pattern.permute.xlu1 %v1197_v15  ;;  %1102 = vset.pattern.permute.xlu0 %v1197_v15 }
 0x17e   :  { %v1133_v34 = vpop.eup %1132  ;;  %1090 = vmatprep.mubr.msk.f32.mxu1 %vm207_vm1, %v463_v49 }
 0x17f   :  { %v446_v35 = vmul.f32 %v1133_v34, %v438_v56  ;;  %1091 = vmatmul.mubr.msk.f32.gmra.mxu1 %vm207_vm1, %v464_v53 }
 0x180   :  { %v1135_v63 = vpop.eup %1134 }
 0x181   :  { %v445_v36 = vmul.f32 %v1135_v63, %v438_v56  ;;  %v458_v37 = vadd.f32 %v450_v59, %v446_v35 }
 0x183   :  { %v457_v58 = vadd.f32 %v450_v59, %v445_v36  ;;  %v466_v39 = vmul.f32 %v458_v37, %v1472_v26 }
 0x185   :  { %v465_v38 = vmul.f32 %v457_v58, %v1475_v29  ;;  %v612_v29 = vrot.slane %v1507_v10, %v1443_v43 }
 0x187   :  { %1093 = vmatprep.mubr.msk.f32.mxu1 %vm207_vm1, %v465_v38 }
 0x188   :  { %1094 = vmatmul.mubr.msk.f32.gmra.mxu1 %vm207_vm1, %v466_v39 }
 0x237   :  { %v1086_v41 = vpop.f32.mrf.mxu1 }
 0x238   :  { %v1513_v26 = vadd.f32 %v1086_v41, %v479_v40 }
 0x239   :  { %v570_v48 = vpop.f32.mrf.mxu1 }
 0x23a   :  { %v614_v46 = vmul.f32 %v612_v29, %v1513_v26  ;;  %v1518_v52 = vadd.f32 %v570_v48, %v479_v40 }
 0x23b   :  { %v1089_v50 = vpop.f32.mrf.mxu1 }
 0x23c   :  { %v626_v56 = vadd.f32 %v624_v44, %v614_v46  ;;  %v613_v57 = vmul.f32 %v612_v29, %v1518_v52  ;;  %v1521_v59 = vadd.f32 %v1089_v50, %v479_v40 }
 0x23d   :  { %v580_v60 = vpop.f32.mrf.mxu1 }
 0x23e   :  { %v989_v61 = vmul.f32 -1.442695, %v626_v56  ;;  %v625_v62 = vadd.f32 %v624_v44, %v613_v57  ;;  %v616_v3 = vmul.f32 %v612_v29, %v1521_v59  ;;  %v1524_v4 = vadd.f32 %v580_v60, %v479_v40 }
 0x23f   :  { %v1092_v7 = vpop.f32.mrf.mxu1  ;;  %v696_v57 = vrot.slane %v1507_v10, %v1482_v54 }
 0x240   :  { %1136 = vpow2.f32 %v989_v61  ;;  %v988_v9 = vmul.f32 -1.442695, %v625_v62  ;;  %v628_v11 = vadd.f32 %v624_v44, %v616_v3  ;;  %v615_v12 = vmul.f32 %v612_v29, %v1524_v4 }
 0x241   :  { %v1527_v13 = vadd.f32 %v1092_v7, %v479_v40  ;;  %v590_v17 = vpop.f32.mrf.mxu1 }
 0x242   :  { %1138 = vpow2.f32 %v988_v9  ;;  %v991_v18 = vmul.f32 -1.442695, %v628_v11  ;;  %v627_v19 = vadd.f32 %v624_v44, %v615_v12  ;;  %v1529_v20 = vadd.f32 %v590_v17, %v479_v40 }
 0x243   :  { %v618_v21 = vmul.f32 %v612_v29, %v1527_v13 }
 0x244   :  { %1140 = vpow2.f32 %v991_v18  ;;  %v990_v42 = vmul.f32 -1.442695, %v627_v19  ;;  %v617_v22 = vmul.f32 %v612_v29, %v1529_v20 }
 0x245   :  { %v630_v24 = vadd.f32 %v624_v44, %v618_v21 }
 0x246   :  { %1142 = vpow2.f32 %v990_v42  ;;  %v629_v25 = vadd.f32 %v624_v44, %v617_v22 }
 0x247   :  { %v993_v27 = vmul.f32 -1.442695, %v630_v24 }
 0x248   :  { %v992_v28 = vmul.f32 -1.442695, %v629_v25  ;;  %v1095_v30 = vpop.f32.mrf.mxu1 }
 0x249   :  { %1144 = vpow2.f32 %v993_v27  ;;  %v1533_v31 = vadd.f32 %v1095_v30, %v479_v40 }
 0x24a   :  { %1146 = vpow2.f32 %v992_v28  ;;  %v600_v32 = vpop.f32.mrf.mxu1 }
 0x24b   :  { %v620_v33 = vmul.f32 %v612_v29, %v1533_v31  ;;  %v1536_v49 = vadd.f32 %v600_v32, %v479_v40 }
 0x24d   :  { %v1137_v53 = vpop.eup %1136  ;;  %v632_v34 = vadd.f32 %v624_v44, %v620_v33  ;;  %v619_v35 = vmul.f32 %v612_v29, %v1536_v49 }
 0x24e   :  { %v658_v63 = vadd.f32 1.0, %v1137_v53 }
 0x24f   :  { %v1139_v36 = vpop.eup %1138  ;;  %v995_v37 = vmul.f32 -1.442695, %v632_v34  ;;  %v631_v58 = vadd.f32 %v624_v44, %v619_v35  ;;  %v684_v44 = vrot.slane %v1507_v10, %v1479_v51 }
 0x250   :  { %1148 = vrcp.f32 %v658_v63  ;;  %v657_v38 = vadd.f32 1.0, %v1139_v36 }
 0x251   :  { %v1141_v39 = vpop.eup %1140  ;;  %1150 = vpow2.f32 %v995_v37  ;;  %v994_v15 = vmul.f32 -1.442695, %v631_v58 }
 0x252   :  { %1152 = vrcp.f32 %v657_v38  ;;  %v660_v41 = vadd.f32 1.0, %v1141_v39 }
 0x253   :  { %v1143_v48 = vpop.eup %1142  ;;  %1154 = vpow2.f32 %v994_v15 }
 0x254   :  { %1156 = vrcp.f32 %v660_v41  ;;  %v659_v40 = vadd.f32 1.0, %v1143_v48 }
 0x256   :  { %v1145_v46 = vpop.eup %1144  ;;  %1158 = vrcp.f32 %v659_v40 }
 0x257   :  { %v1147_v50 = vpop.eup %1146  ;;  %v662_v56 = vadd.f32 1.0, %v1145_v46 }
 0x258   :  { %v661_v29 = vadd.f32 1.0, %v1147_v50 }
 0x259   :  { %1160 = vrcp.f32 %v662_v56 }
 0x25a   :  { %1162 = vrcp.f32 %v661_v29 }
 0x25d   :  { %v1149_v60 = vpop.eup %1148 }
 0x25e   :  { %v1151_v61 = vpop.eup %1150  ;;  %v686_v62 = vmul.f32 %v1149_v60, %v684_v44 }
 0x25f   :  { %v1153_v3 = vpop.eup %1152  ;;  %v664_v7 = vadd.f32 1.0, %v1151_v61 }
 0x260   :  { %v1155_v9 = vpop.eup %1154  ;;  %v698_v11 = vadd.f32 %v696_v57, %v686_v62  ;;  %v685_v12 = vmul.f32 %v1153_v3, %v684_v44 }
 0x261   :  { %v1157_v17 = vpop.eup %1156  ;;  %1164 = vrcp.f32 %v664_v7  ;;  %v663_v18 = vadd.f32 1.0, %v1155_v9 }
 0x262   :  { %v706_v19 = vmul.f32 %v698_v11, %v1513_v26  ;;  %v697_v21 = vadd.f32 %v696_v57, %v685_v12  ;;  %v688_v42 = vmul.f32 %v1157_v17, %v684_v44 }
 0x263   :  { %v1159_v22 = vpop.eup %1158  ;;  %1166 = vrcp.f32 %v663_v18 }
 0x264   :  { %v717_v10 = vsel %vm713_vm3, %v706_v19, 0.0  ;;  %v705_v24 = vmul.f32 %v697_v21, %v1518_v52  ;;  %v700_v25 = vadd.f32 %v696_v57, %v688_v42  ;;  %v687_v27 = vmul.f32 %v1159_v22, %v684_v44 }
 0x265   :  { %718 = vadd.xlane.f32.xlu1 %v717_v10 }
 0x266   :  { %v1161_v28 = vpop.eup %1160  ;;  %v714_v30 = vsel %vm713_vm3, %v705_v24, 0.0  ;;  %v708_v32 = vmul.f32 %v700_v25, %v1521_v59  ;;  %v699_v33 = vadd.f32 %v696_v57, %v687_v27 }
 0x267   :  { %v1163_v53 = vpop.eup %1162  ;;  %715 = vadd.xlane.f32.xlu0 %v714_v30  ;;  %v690_v26 = vmul.f32 %v1161_v28, %v684_v44 }
 0x268   :  { %v689_v34 = vmul.f32 %v1163_v53, %v684_v44  ;;  %v723_v35 = vsel %vm713_vm3, %v708_v32, 0.0  ;;  %v707_v63 = vmul.f32 %v699_v33, %v1524_v4 }
 0x269   :  { %v702_v37 = vadd.f32 %v696_v57, %v690_v26 }
 0x26a   :  { %v701_v36 = vadd.f32 %v696_v57, %v689_v34  ;;  %v720_v38 = vsel %vm713_vm3, %v707_v63, 0.0 }
 0x26b   :  { %724 = vadd.xlane.f32.xlu0 %v723_v35  ;;  %v710_v59 = vmul.f32 %v702_v37, %v1527_v13  ;;  %v740_v13 = vld [vmem:[%s1608_s2] sm:$0xff]  ;;  %s1198_s2 = smov [#allocation2]  }
 0x26c   :  { %v709_v52 = vmul.f32 %v701_v36, %v1529_v20  ;;  %s956_s15 = sshll.u32 %s1198_s2, 4  ;;  %s957_s15 = int_to_ptr.vmem [resolvable:$true] %s956_s15 }
 0x26d   :  { %v729_v4 = vsel %vm713_vm3, %v710_v59, 0.0  ;;  %v850_v59 = vsub.s32 5, %v1267_v8  ;;  %s1172_s0 = scalar_lea.vmem %s957_s15, 128  ;;  %p1177_p1 = scmp.lt.s32.totalorder %s957_s15, %s957_s15 }
 0x26e   :  { %v1165_v58 = vpop.eup %1164  ;;  %v726_v39 = vsel %vm713_vm3, %v709_v52, 0.0  ;;  %p1173_p0 = scmp.ne.s32.totalorder %s957_s15, %s1172_s0  ;;  %p1178_p2 = scmp.lt.s32.totalorder %s1172_s0, %s1172_s0 }
 0x26f   :  { %721 = vadd.xlane.f32.xlu0 %v720_v38  ;;  %727 = vadd.xlane.f32.xlu1 %v726_v39  ;;  %v692_v15 = vmul.f32 %v1165_v58, %v684_v44 }
 0x270   :  { %v1167_v41 = vpop.eup %1166  ;;  %p1179_p3 = por %p1178_p2, %p1177_p1 }
 0x271   :  { %v704_v48 = vadd.f32 %v696_v57, %v692_v15  ;;  %v691_v40 = vmul.f32 %v1167_v41, %v684_v44  ;;  %v739_v44 = vand.u32 127, %v41_v2 }
 0x272   :  { %p1180_p4 = pnand %p1179_p3, %p1173_p0 }
 0x273   :  { %730 = vadd.xlane.f32.xlu0 %v729_v4  ;;  %v712_v46 = vmul.f32 %v704_v48, %v1533_v31  ;;  %v703_v50 = vadd.f32 %v696_v57, %v691_v40  ;;  %v755_v61 = vsub.s32 %v739_v44, %v1267_v8  ;;  %v864_v48 = vsub.s32 7, %v1267_v8 }
 0x275   :  { %v711_v20 = vmul.f32 %v703_v50, %v1536_v49  ;;  %v735_v56 = vsel %vm713_vm3, %v712_v46, 0.0 }
 0x277   :  { %736 = vadd.xlane.f32.xlu0 %v735_v56  ;;  %v732_v29 = vsel %vm713_vm3, %v711_v20, 0.0 }
 0x278   :  { %733 = vadd.xlane.f32.xlu1 %v732_v29 }
 0x289   :  { %742 = vperm.xlu1 %1101, %v740_v13  }
 0x2ee   :  { %v719_v57 = vpop.xlane.xlu1 %718 }
 0x2ef   :  { %v760_v49 = vrot.slane %v719_v57, %v755_v61 }
 0x2f0   :  { %v716_v60 = vpop.xlane.xlu0 %715 }
 0x2f1   :  { %v756_v62 = vrot.slane %v716_v60, %v755_v61 }
 0x2f3   :  { %v786_v9 = vsel %vm785_vm4, %v760_v49, %v756_v62 }
 0x2f4   :  { %v725_v31 = vpop.xlane.xlu0 %724 }
 0x2f5   :  { %v768_v11 = vrot.slane %v725_v31, %v755_v61 }
 0x2f8   :  { %v722_v3 = vpop.xlane.xlu0 %721  ;;  %v728_v17 = vpop.xlane.xlu1 %727 }
 0x2f9   :  { %v764_v7 = vrot.slane %v722_v3, %v755_v61  ;;  %v772_v19 = vrot.slane %v728_v17, %v755_v61 }
 0x2fb   :  { %v788_v12 = vsel %vm787_vm5, %v764_v7, %v786_v9 }
 0x2fc   :  { %v731_v18 = vpop.xlane.xlu0 %730  ;;  %v790_v2 = vsel %vm789_vm6, %v768_v11, %v788_v12 }
 0x2fd   :  { %v776_v21 = vrot.slane %v731_v18, %v755_v61  ;;  %v792_v42 = vsel %vm791_vm7, %v772_v19, %v790_v2 }
 0x2ff   :  { %v794_v27 = vsel %vm793_vm8, %v776_v21, %v792_v42 }
 0x300   :  { %v737_v22 = vpop.xlane.xlu0 %736 }
 0x301   :  { %v784_v10 = vrot.slane %v737_v22, %v755_v61  ;;  %v734_v24 = vpop.xlane.xlu1 %733 }
 0x302   :  { %v780_v25 = vrot.slane %v734_v24, %v755_v61 }
 0x304   :  { %v796_v28 = vsel %vm795_vm9, %v780_v25, %v794_v27 }
 0x305   :  { %v743_v30 = vpop.permute.xlu1 %742  ;;  %v798_v32 = vsel %vm797_vm10, %v784_v10, %v796_v28 }
 0x306   :  { %vm744_vm12 = vcmp.lt.s32.totalorder %v739_v44, %v743_v30 }
 0x307   :  { %v800_v33 = vsel %vm744_vm12, %v798_v32, -4.2949673e+09 }
 0x308   :  { %v802_v53 = vsel %vm801_vm11, %v800_v33, -inf }
 0x309   :  { %803 = vmax.xlane.f32.xlu0 %v802_v53 }
 0x392   :  { %v804_v26 = vpop.xlane.xlu0 %803 }
 0x393   :  { %v805_v34 = vsub.f32 %v800_v33, %v804_v26 }
 0x395   :  { %v806_v35 = vmul.f32 1.442695, %v805_v34 }
 0x397   :  { %1168 = vpow2.f32 %v806_v35 }
 0x3a4   :  { %v1169_v63 = vpop.eup %1168 }
 0x3a5   :  { %v808_v36 = vsel %vm801_vm11, %v1169_v63, 0.0 }
 0x3a6   :  { %809 = vadd.xlane.f32.xlu0 %v808_v36 }
 0x42f   :  { %v810_v37 = vpop.xlane.xlu0 %809 }
 0x430   :  { %1170 = vrcp.f32 %v810_v37 }
 0x43d   :  { %v1171_v52 = vpop.eup %1170 }
 0x43e   :  { %v812_v58 = vmul.f32 %v1171_v52, %v1169_v63 }
 0x440   :  { %v823_v38 = vrot.slane %v812_v58, %v1443_v43  ;;  %v816_v39 = vrot.slane %v812_v58, %v1286_v16  ;;  %v830_v15 = vrot.slane %v812_v58, %v1448_v45  ;;  %v851_v41 = vrot.slane %v812_v58, %v850_v59 }
 0x441   :  { %v837_v40 = vrot.slane %v812_v58, %v1482_v54  ;;  %v865_v4 = vrot.slane %v812_v58, %v864_v48  ;;  %v844_v43 = vrot.slane %v812_v58, %v1479_v51  ;;  %v857_v16 = vsub.s32 6, %v1267_v8 }
 0x442   :  { %825 = vbcast.lane.b32.xlu1 %v823_v38, 256  ;;  %818 = vbcast.lane.b32.xlu0 %v816_v39, 256 }
 0x443   :  { %v858_v46 = vrot.slane %v812_v58, %v857_v16 }
 0x446   :  { %832 = vbcast.lane.b32.xlu1 %v830_v15, 256  ;;  %853 = vbcast.lane.b32.xlu0 %v851_v41, 256 }
 0x44a   :  { %839 = vbcast.lane.b32.xlu1 %v837_v40, 256  ;;  %867 = vbcast.lane.b32.xlu0 %v865_v4, 256 }
 0x44e   :  { %846 = vbcast.lane.b32.xlu1 %v844_v43, 256 }
 0x452   :  { %860 = vbcast.lane.b32.xlu1 %v858_v46, 256 }
 0x4b4   :  { %v826_v50 = vpop.permute.xlu1 %825  ;;  %v819_v20 = vpop.permute.xlu0 %818 }
 0x4b5   :  { %v870_v45 = vmul.f32 %v826_v50, %v1256_v5  ;;  %v869_v56 = vmul.f32 %v819_v20, %v1242_v0 }
 0x4b7   :  { %v884_v29 = vsel %vm198_vm0, %v870_v45, 0.0  ;;  %v877_v54 = vsel %vm198_vm0, %v869_v56, 0.0 }
 0x4b8   :  { %v885_v13 = vrot.slane %v884_v29, 4  ;;  %v878_v44 = vrot.slane %v877_v54, 4  ;;  %v833_v60 = vpop.permute.xlu1 %832  ;;  %v854_v61 = vpop.permute.xlu0 %853 }
 0x4b9   :  { %v871_v51 = vmul.f32 %v833_v60, %v1283_v14  ;;  %v874_v8 = vmul.f32 %v854_v61, %v1261_v6 }
 0x4ba   :  { %v886_v31 = vadd.f32 %v885_v13, %v884_v29  ;;  %v879_v57 = vadd.f32 %v878_v44, %v877_v54 }
 0x4bb   :  { %v891_v62 = vsel %vm198_vm0, %v871_v51, 0.0  ;;  %v912_v5 = vsel %vm198_vm0, %v874_v8, 0.0 }
 0x4bc   :  { %v887_v49 = vrot.slane %v886_v31, 2  ;;  %v880_v0 = vrot.slane %v879_v57, 2  ;;  %v892_v3 = vrot.slane %v891_v62, 4  ;;  %v840_v7 = vpop.permute.xlu1 %839  ;;  %v868_v9 = vpop.permute.xlu0 %867  ;;  %v913_v11 = vrot.slane %v912_v5, 4 }
 0x4bd   :  { %v872_v12 = vmul.f32 %v840_v7, %v1247_v1  ;;  %v876_v17 = vmul.f32 %v868_v9, %v1376_v55 }
 0x4be   :  { %v893_v18 = vadd.f32 %v892_v3, %v891_v62  ;;  %v888_v2 = vadd.f32 %v887_v49, %v886_v31  ;;  %v881_v19 = vadd.f32 %v880_v0, %v879_v57  ;;  %v914_v22 = vadd.f32 %v913_v11, %v912_v5 }
 0x4bf   :  { %v898_v14 = vsel %vm198_vm0, %v872_v12, 0.0  ;;  %v926_v6 = vsel %vm198_vm0, %v876_v17, 0.0 }
 0x4c0   :  { %v894_v21 = vrot.slane %v893_v18, 2  ;;  %v847_v42 = vpop.permute.xlu1 %846  ;;  %v899_v10 = vrot.slane %v898_v14, 4  ;;  %v927_v24 = vrot.slane %v926_v6, 4  ;;  %v889_v55 = vrot.slane %v888_v2, 1 }
 0x4c1   :  { %v873_v25 = vmul.f32 %v847_v42, %v1299_v23  ;;  %v882_v53 = vrot.slane %v881_v19, 1  ;;  %v915_v26 = vrot.slane %v914_v22, 2 }
 0x4c2   :  { %v895_v27 = vadd.f32 %v894_v21, %v893_v18  ;;  %v900_v28 = vadd.f32 %v899_v10, %v898_v14  ;;  %v928_v30 = vadd.f32 %v927_v24, %v926_v6  ;;  %v890_v39 = vadd.f32 %v889_v55, %v888_v2 }
 0x4c3   :  { %v905_v1 = vsel %vm198_vm0, %v873_v25, 0.0  ;;  %v883_v59 = vadd.f32 %v882_v53, %v881_v19  ;;  %v916_v15 = vadd.f32 %v915_v26, %v914_v22 }
 0x4c4   :  { %v906_v32 = vrot.slane %v905_v1, 4  ;;  %v861_v33 = vpop.permute.xlu1 %860  ;;  %v901_v34 = vrot.slane %v900_v28, 2  ;;  %v896_v63 = vrot.slane %v895_v27, 1  ;;  %v929_v52 = vrot.slane %v928_v30, 2 }
 0x4c5   :  { %v875_v35 = vmul.f32 %v861_v33, %v1354_v47  ;;  %v941_v47 = vsel %vm785_vm4, %v890_v39, %v883_v59  ;;  %v917_v20 = vrot.slane %v916_v15, 1 }
 0x4c6   :  { %v907_v36 = vadd.f32 %v906_v32, %v905_v1  ;;  %v902_v37 = vadd.f32 %v901_v34, %v900_v28  ;;  %v897_v48 = vadd.f32 %v896_v63, %v895_v27  ;;  %v930_v16 = vadd.f32 %v929_v52, %v928_v30 }
 0x4c7   :  { %v919_v58 = vsel %vm198_vm0, %v875_v35, 0.0  ;;  %v918_v61 = vadd.f32 %v917_v20, %v916_v15 }
 0x4c8   :  { %v908_v23 = vrot.slane %v907_v36, 2  ;;  %v920_v38 = vrot.slane %v919_v58, 4  ;;  %v903_v41 = vrot.slane %v902_v37, 1  ;;  %v942_v45 = vsel %vm787_vm5, %v897_v48, %v941_v47 }
 0x4c9   :  { %v931_v54 = vrot.slane %v930_v16, 1 }
 0x4ca   :  { %v909_v40 = vadd.f32 %v908_v23, %v907_v36  ;;  %v921_v4 = vadd.f32 %v920_v38, %v919_v58  ;;  %v904_v43 = vadd.f32 %v903_v41, %v902_v37 }
 0x4cb   :  { %v932_v8 = vadd.f32 %v931_v54, %v930_v16 }
 0x4cc   :  { %v910_v46 = vrot.slane %v909_v40, 1  ;;  %v922_v50 = vrot.slane %v921_v4, 2  ;;  %v943_v13 = vsel %vm789_vm6, %v904_v43, %v942_v45 }
 0x4ce   :  { %v911_v56 = vadd.f32 %v910_v46, %v909_v40  ;;  %v923_v29 = vadd.f32 %v922_v50, %v921_v4 }
 0x4d0   :  { %v924_v44 = vrot.slane %v923_v29, 1  ;;  %v944_v60 = vsel %vm791_vm7, %v911_v56, %v943_v13 }
 0x4d1   :  { %v945_v31 = vsel %vm793_vm8, %v918_v61, %v944_v60 }
 0x4d2   :  { %v925_v51 = vadd.f32 %v924_v44, %v923_v29 }
 0x4d4   :  { %v946_v57 = vsel %vm795_vm9, %v925_v51, %v945_v31 }
 0x4d5   :  { %v947_v62 = vsel %vm797_vm10, %v932_v8, %v946_v57 }
 0x4d6   :  { %949 = vst.msk [vmem:[#allocation2] sm:$0xff] %vm198_vm0, %v947_v62 }
 0x4d7   :  { %1183 = shalt.err (!%p1180_p4)
}
 0x4d8   :  { %959 = dma.vmem_to_hbm [thread:$0]  %s957_s15, 128, %s1613_s7, [#allocation3]  }
 0x4d9   :  { %1192 = dma.done.wait [#allocation3], 128  }
 0x4da   :  { %1193 = vsyncadd [#allocation3], 4294967168 }
 0x4db   :  { %963 = vsyncpa [#allocation3], 1 }

</bundles_post_ra>
